<compile_context>
chip_gen: v7x
topology: tpu7x:2x2x1
jax: 0.10.0
libtpu: 0.0.40
codegen_flags: <defaults>
</compile_context>

<pallas_src>
import functools

import numpy as np
import jax
import jax.numpy as jnp
from jax import lax
from jax.experimental import pallas as pl
from jax.experimental.pallas import tpu as pltpu

# cfg.TRAINER.CALIP.* hyper-parameters (deterministic, in-script)
ALPHA_T = 2.0
ALPHA_S = 1.0
BETA_1 = 1.0
BETA_2 = 0.5
BETA_3 = 0.25
# nn.Parameter(torch.ones([]) * np.log(1/0.07)).exp()  (plain Python float)
LOGIT_SCALE = float(np.exp(np.log(1.0 / 0.07)))

NEG_BIG = -1e30  # Python float -> jaxpr literal (never a captured constant)


def _softmax_last(x):
    # f32 in, f32 out; denominator reciprocal goes to the EUP slot.
    x = x - jnp.max(x, axis=-1, keepdims=True)
    e = jnp.exp(x)
    return e * pl.reciprocal(jnp.sum(e, axis=-1, keepdims=True), approx=True)


def calip_pf_kernel(fs_ref, ft_ref, fv_ref, o_ref, *, n_true, m_true, tb):
    # fs_ref: [tb, Mp, Dp] f32   ft_ref: [Np, Dp] bf16
    # fv_ref: [tb, 1, Dp] f32    o_ref : [tb, 1, Np] f32
    ft = ft_ref[...]                                   # [Np, Dp] bf16
    np_, dp = ft.shape
    mp = fs_ref.shape[1]

    # ---- padding masks (all constants are Python scalars -> literals) -----
    n_idx = lax.broadcasted_iota(jnp.int32, (1, np_), 1)
    n_bias = jnp.where(n_idx >= n_true, NEG_BIG, 0.0).astype(jnp.float32)   # [1, Np]
    m_idx = lax.broadcasted_iota(jnp.int32, (1, mp, 1), 1)
    m_valid = m_idx < m_true                                                # [1, Mp, 1]
    m_bias = jnp.where(m_valid, 0.0, NEG_BIG).astype(jnp.float32)           # [1, Mp, 1]

    # ---- L2-normalize Fs rows in f32 (EUP rsqrt), then cast for the MXU ---
    fs = fs_ref[...].reshape(tb * mp, dp)                                   # f32
    inv_norm = lax.rsqrt(jnp.sum(fs * fs, axis=-1, keepdims=True) + 1e-30)
    fs_n32 = fs * inv_norm                                                  # [tb*Mp, Dp] f32
    fs_n = fs_n32.astype(jnp.bfloat16)

    # ---- scores: ONE stacked MXU call across the tb images ----------------
    # A_all = Fs_n @ Ft^T   [tb*Mp, Np]  (bf16 operands, f32 accumulation)
    a_all = lax.dot_general(fs_n, ft, (((1,), (1,)), ((), ())),
                            preferred_element_type=jnp.float32)

    # Ps = softmax(A / alpha_s) over classes (lane axis); padded N masked.
    ps = _softmax_last(a_all * (1.0 / ALPHA_S) + n_bias)                    # f32

    # Fsa_all = Ps @ Ft : second stacked MXU call   [tb*Mp, Dp]
    fsa = lax.dot_general(ps.astype(jnp.bfloat16), ft, (((1,), (0,)), ((), ())),
                          preferred_element_type=jnp.float32)

    # ---- per-image views (Mp multiple of 8 -> layout-free reshapes) -------
    a3 = a_all.reshape(tb, mp, np_)
    fsa3 = fsa.reshape(tb, mp, dp)
    fs3_n32 = fs_n32.reshape(tb, mp, dp)
    fv3 = fv_ref[...]                                                       # [tb, 1, Dp] f32

    # ---- beta2 term via algebra (no A^T recompute, no Fta matmul) ---------
    # Fv @ (Pt @ Fs_n)^T == sum_m (Fs_n[m] . Fv) * Pt^T[m, :], where Pt^T is
    # the column softmax of A / alpha_t (softmax over the M axis).
    at = a3 * (1.0 / ALPHA_T) + m_bias
    at = at - jnp.max(at, axis=1, keepdims=True)
    e = jnp.exp(at)
    ptT = e * pl.reciprocal(jnp.sum(e, axis=1, keepdims=True), approx=True)  # [tb, Mp, Np]
    q = jnp.sum(fs3_n32 * fv3, axis=-1, keepdims=True)                       # [tb, Mp, 1]
    t2 = BETA_2 * jnp.sum(q * ptT, axis=1)                                   # [tb, Np]

    # ---- Fva = mean + max pooling over the true M spatial tokens ----------
    mean = jnp.sum(jnp.where(m_valid, fsa3, 0.0), axis=1) * (1.0 / m_true)   # [tb, Dp]
    mx = jnp.max(jnp.where(m_valid, fsa3, NEG_BIG), axis=1)                  # [tb, Dp]
    fva = mean + mx

    # ---- beta1 + beta3 terms share Ft: one stacked [tb, Dp] @ Ft^T --------
    comb = (BETA_1 * fv3.reshape(tb, dp) + BETA_3 * fva).astype(jnp.bfloat16)
    t13 = lax.dot_general(comb, ft, (((1,), (1,)), ((), ())),
                          preferred_element_type=jnp.float32)                # [tb, Np]

    # single dense store per grid step
    o_ref[...] = (LOGIT_SCALE * (t13 + t2))[:, None, :]                      # [tb, 1, Np]


def _round_up(x, m):
    return ((x + m - 1) // m) * m


def _pad_to(x, shape):
    pads = [(0, s - d) for d, s in zip(x.shape, shape)]
    return jnp.pad(x, pads)


def _vmem_limit_bytes():
    # Generation-aware VMEM budget: ~96 MiB on v5e/v6e (128 MiB physical),
    # ~40 MiB on v7x (64 MiB physical), 32 MiB conservative fallback.
    try:
        cap = int(pltpu.get_tpu_info().vmem_capacity_bytes)
        return int(max(32 * 1024 * 1024,
                       min(cap - 24 * 1024 * 1024, 96 * 1024 * 1024)))
    except Exception:
        return 32 * 1024 * 1024


def calip_pf_block(Fs, Ft, Fv, *, tb=None):
    """Pallas implementation of CALIP_PF_Block.forward.

    Fs: [B, M, D]   Ft: [N, D]   Fv: [B, D] (or [B, 1, D])
    returns [B, 1, N] float32
    """
    B, M, D = Fs.shape
    N = Ft.shape[0]
    if Fv.ndim == 2:
        Fv = Fv[:, None, :]

    if tb is None:
        # <=4 images per step (bounds the f32 [tb*Mp, Np] temporaries under
        # v7x's 64 MiB VMEM) and >=2 grid steps whenever B >= 2 so the
        # "parallel" batch axis can split across both v7x TensorCores.
        tb = max(1, min(4, B // 2))
    Bp = _round_up(B, tb)
    Mp = _round_up(M, 8)                     # sublane-aligned: layout-free reshapes
    Dp = _round_up(D, 128)                   # lane-dense feature dim
    Np = _round_up(N, 128)                   # lane-dense class dim (masked)

    # D padding is transparent (zeros contribute nothing to dots / norms);
    # N padding is masked in-kernel (beta1/beta3 columns are zero, beta2
    # columns are nonzero -> the final [:N] slice below is load-bearing);
    # M / batch padding rows are masked / finite thanks to the norm eps.
    fs_p = _pad_to(Fs.astype(jnp.float32), (Bp, Mp, Dp))     # f32: normalize in-kernel
    ft_p = _pad_to(Ft.astype(jnp.bfloat16), (Np, Dp))
    fv_p = _pad_to(Fv.astype(jnp.float32), (Bp, 1, Dp))

    kernel = functools.partial(calip_pf_kernel, n_true=N, m_true=M, tb=tb)
    out = pl.pallas_call(
        kernel,
        out_shape=jax.ShapeDtypeStruct((Bp, 1, Np), jnp.float32),
        grid_spec=pltpu.PrefetchScalarGridSpec(
            num_scalar_prefetch=0,
            grid=(Bp // tb,),
            in_specs=[
                pl.BlockSpec((tb, Mp, Dp), lambda i: (i, 0, 0)),
                # batch-invariant Ft: constant index_map, fetched once
                pl.BlockSpec((Np, Dp), lambda i: (0, 0)),
                pl.BlockSpec((tb, 1, Dp), lambda i: (i, 0, 0)),
            ],
            out_specs=pl.BlockSpec((tb, 1, Np), lambda i: (i, 0, 0)),
        ),
        compiler_params=pltpu.CompilerParams(
            dimension_semantics=("parallel",),
            vmem_limit_bytes=_vmem_limit_bytes()),
    )(fs_p, ft_p, fv_p)
    return out[:B, :, :N]


# ----------------------------------------------------------------------------
# Glue: synthetic stand-in for clip_model.visual (image encoder).
# TODO(synk): real pretrained CLIP visual/text encoders have no in-script
#             equivalent; replaced by a deterministic patch-embed + pooling.
# ----------------------------------------------------------------------------
def synthetic_image_encoder(image, w_patch, w_proj, patch=4):
    # image: NCHW [B, C, H, W]
    B, C, H, W = image.shape
    p = patch
    x = image.reshape(B, C, H // p, p, W // p, p)
    x = x.transpose(0, 2, 4, 1, 3, 5).reshape(B, (H // p) * (W // p), C * p * p)
    Fs = x @ w_patch                                 # [B, M, D] spatial feats
    image_features = jnp.mean(Fs, axis=1) @ w_proj   # [B, D] global feats
    return image_features, Fs


def custom_calip_pf_forward(image, text_features, w_patch, w_proj):
    """Mirrors CustomCALIP_PF.forward."""
    image_features, Fs = synthetic_image_encoder(image, w_patch, w_proj)
    image_features = image_features / jnp.linalg.norm(
        image_features, axis=-1, keepdims=True)
    Ft = text_features  # already L2-normalized (done in CustomCLIP.__init__)
    return calip_pf_block(Fs, Ft, image_features)


# ----------------------------------------------------------------------------
# Pure-JAX f32 reference of CALIP_PF_Block.forward (faithful to PyTorch code)
# ----------------------------------------------------------------------------
def calip_pf_ref(Fs, Ft, Fv):
    B = Fv.shape[0]
    Ftb = jnp.broadcast_to(Ft[None], (B,) + Ft.shape)          # [B, N, D]
    if Fv.ndim == 2:
        Fv = Fv[:, None, :]                                    # [B, 1, D]
    Fs = Fs / jnp.linalg.norm(Fs, axis=-1, keepdims=True)
    A = Fs @ jnp.swapaxes(Ftb, 1, 2)                           # [B, M, N]
    Fsa = jax.nn.softmax(A / ALPHA_S, axis=-1) @ Ftb           # [B, M, D]
    Fta = jax.nn.softmax(jnp.swapaxes(A, 1, 2) / ALPHA_T, axis=-1) @ Fs
    Fva = (jnp.mean(Fsa, axis=1, keepdims=True)
           + jnp.max(Fsa, axis=1, keepdims=True))              # [B, 1, D]
    ls = LOGIT_SCALE
    res = BETA_1 * ls * (Fv @ jnp.swapaxes(Ftb, 1, 2))
    res = res + BETA_2 * ls * (Fv @ jnp.swapaxes(Fta, 1, 2))
    res = res + BETA_3 * ls * (Fva @ jnp.swapaxes(Ftb, 1, 2))
    return res


if __name__ == "__main__":
    # Small shapes: B=2 images, 3x16x16, patch 4 -> M=16 tokens, D=32, N=8 classes
    B, C, H, W = 2, 3, 16, 16
    PATCH, D, N = 4, 32, 8
    PDIM = C * PATCH * PATCH

    key = jax.random.PRNGKey(0)
    k_img, k_txt, k_wp, k_wj = jax.random.split(key, 4)

    image = jax.random.normal(k_img, (B, C, H, W), dtype=jnp.float32)
    # clip_model.encode_text(prompts) stand-in, normalized as in CustomCLIP
    text_features = jax.random.normal(k_txt, (N, D), dtype=jnp.float32)
    text_features = text_features / jnp.linalg.norm(
        text_features, axis=-1, keepdims=True)
    w_patch = jax.random.normal(k_wp, (PDIM, D), dtype=jnp.float32) * 0.05
    w_proj = jax.random.normal(k_wj, (D, D), dtype=jnp.float32) * 0.05

    out = custom_calip_pf_forward(image, text_features, w_patch, w_proj)
    out = jax.block_until_ready(out)

    # Validate against the pure-JAX f32 reference of the PyTorch block.
    # Tolerance accounts for bf16 MXU operands (f32 accumulation) in-kernel.
    img_feat, Fs = synthetic_image_encoder(image, w_patch, w_proj)
    img_feat = img_feat / jnp.linalg.norm(img_feat, axis=-1, keepdims=True)
    ref = calip_pf_ref(Fs, text_features, img_feat)

    assert out.shape == (B, 1, N), out.shape
    np.testing.assert_allclose(np.asarray(out), np.asarray(ref),
                               rtol=5e-2, atol=5e-2)
    print("KERNEL_OK")
</pallas_src>

<mosaic_0001>
module attributes {stable_mosaic.version = 11 : i64} {
  func.func @calip_pf_kernel(%arg0: i32, %arg1: memref<1x16x128xf32, #tpu.memory_space<vmem>>, %arg2: memref<128x128xbf16, #tpu.memory_space<vmem>>, %arg3: memref<1x1x128xf32, #tpu.memory_space<vmem>>, %arg4: memref<1x1x128xf32, #tpu.memory_space<vmem>>) attributes {dimension_semantics = [#tpu.dimension_semantics<parallel>], iteration_bounds = array<i64: 2>, scalar_prefetch = 0 : i64, scratch_operands = 0 : i64, tpu.core_type = #tpu.core_type<tc>, window_params = [{transform_indices = @transform_0, window_bounds = array<i64: 1, 16, 128>}, {pipeline_mode = #tpu.pipeline_mode<synchronous>, transform_indices = @transform_1, window_bounds = array<i64: 128, 128>}, {transform_indices = @transform_2, window_bounds = array<i64: 1, 1, 128>}, {transform_indices = @transform_3, window_bounds = array<i64: 1, 1, 128>}]} {
    %c0 = arith.constant 0 : index
    %c0_0 = arith.constant 0 : index
    %0 = vector.load %arg2[%c0, %c0_0] : memref<128x128xbf16, #tpu.memory_space<vmem>>, vector<128x128xbf16>
    %1 = tpu.iota {dimensions = array<i32: 1>} : vector<1x128xi32>
    %c8_i32 = arith.constant 8 : i32
    %2 = vector.broadcast %c8_i32 : i32 to vector<1x128xi32>
    %3 = arith.cmpi sge, %1, %2 : vector<1x128xi32>
    %cst = arith.constant -1.000000e+30 : f32
    %cst_1 = arith.constant 0.000000e+00 : f32
    %4 = vector.broadcast %cst : f32 to vector<1x128xf32>
    %5 = vector.broadcast %cst_1 : f32 to vector<1x128xf32>
    %6 = arith.select %3, %4, %5 : vector<1x128xi1>, vector<1x128xf32>
    %7 = tpu.iota {dimensions = array<i32: 1>} : vector<1x16x1xi32>
    %c16_i32 = arith.constant 16 : i32
    %8 = vector.broadcast %c16_i32 : i32 to vector<1x16x1xi32>
    %9 = arith.cmpi slt, %7, %8 : vector<1x16x1xi32>
    %cst_2 = arith.constant 0.000000e+00 : f32
    %cst_3 = arith.constant -1.000000e+30 : f32
    %10 = vector.broadcast %cst_2 : f32 to vector<1x16x1xf32>
    %11 = vector.broadcast %cst_3 : f32 to vector<1x16x1xf32>
    %12 = arith.select %9, %10, %11 : vector<1x16x1xi1>, vector<1x16x1xf32>
    %c0_4 = arith.constant 0 : index
    %c0_5 = arith.constant 0 : index
    %c0_6 = arith.constant 0 : index
    %13 = vector.load %arg1[%c0_4, %c0_5, %c0_6] : memref<1x16x128xf32, #tpu.memory_space<vmem>>, vector<1x16x128xf32>
    %14 = vector.shape_cast %13 : vector<1x16x128xf32> to vector<16x128xf32>
    %15 = arith.mulf %14, %14 : vector<16x128xf32>
    %cst_7 = arith.constant dense<0.000000e+00> : vector<16xf32>
    %16 = vector.multi_reduction <add>, %15, %cst_7 [1] : vector<16x128xf32> to vector<16xf32>
    %17 = vector.shape_cast %16 : vector<16xf32> to vector<16x1xf32>
    %cst_8 = arith.constant 1.000000e-30 : f32
    %18 = vector.broadcast %cst_8 : f32 to vector<16x1xf32>
    %19 = arith.addf %17, %18 : vector<16x1xf32>
    %20 = math.rsqrt %19 : vector<16x1xf32>
    %21 = vector.broadcast %20 : vector<16x1xf32> to vector<16x128xf32>
    %22 = arith.mulf %14, %21 : vector<16x128xf32>
    %23 = arith.truncf %22 : vector<16x128xf32> to vector<16x128xbf16>
    %cst_9 = arith.constant dense<0.000000e+00> : vector<16x128xf32>
    %24 = tpu.matmul %23, %0, %cst_9 {dimension_numbers = #tpu.dot_dimension_numbers<[1], [1], [0], [0], [0, 0, 1, 0], [], []>} : vector<16x128xbf16>, vector<128x128xbf16>, vector<16x128xf32> -> vector<16x128xf32>
    %cst_10 = arith.constant 1.000000e+00 : f32
    %25 = vector.broadcast %cst_10 : f32 to vector<16x128xf32>
    %26 = arith.mulf %24, %25 : vector<16x128xf32>
    %27 = vector.broadcast %6 : vector<1x128xf32> to vector<16x128xf32>
    %28 = arith.addf %26, %27 : vector<16x128xf32>
    %cst_11 = arith.constant dense<0xFF800000> : vector<16xf32>
    %29 = vector.multi_reduction <maximumf>, %28, %cst_11 [1] : vector<16x128xf32> to vector<16xf32>
    %30 = vector.shape_cast %29 : vector<16xf32> to vector<16x1xf32>
    %31 = vector.broadcast %30 : vector<16x1xf32> to vector<16x128xf32>
    %32 = arith.subf %28, %31 : vector<16x128xf32>
    %33 = math.exp %32 : vector<16x128xf32>
    %cst_12 = arith.constant dense<0.000000e+00> : vector<16xf32>
    %34 = vector.multi_reduction <add>, %33, %cst_12 [1] : vector<16x128xf32> to vector<16xf32>
    %35 = vector.shape_cast %34 : vector<16xf32> to vector<16x1xf32>
    %36 = tpu.reciprocal %35 {approx = true} : vector<16x1xf32> -> vector<16x1xf32>
    %37 = vector.broadcast %36 : vector<16x1xf32> to vector<16x128xf32>
    %38 = arith.mulf %33, %37 : vector<16x128xf32>
    %39 = arith.truncf %38 : vector<16x128xf32> to vector<16x128xbf16>
    %cst_13 = arith.constant dense<0.000000e+00> : vector<16x128xf32>
    %40 = tpu.matmul %39, %0, %cst_13 {dimension_numbers = #tpu.dot_dimension_numbers<[1], [0], [0], [1], [0, 0, 1, 1], [], []>} : vector<16x128xbf16>, vector<128x128xbf16>, vector<16x128xf32> -> vector<16x128xf32>
    %41 = vector.shape_cast %24 : vector<16x128xf32> to vector<1x16x128xf32>
    %42 = vector.shape_cast %40 : vector<16x128xf32> to vector<1x16x128xf32>
    %43 = vector.shape_cast %22 : vector<16x128xf32> to vector<1x16x128xf32>
    %c0_14 = arith.constant 0 : index
    %c0_15 = arith.constant 0 : index
    %c0_16 = arith.constant 0 : index
    %44 = vector.load %arg3[%c0_14, %c0_15, %c0_16] : memref<1x1x128xf32, #tpu.memory_space<vmem>>, vector<1x1x128xf32>
    %cst_17 = arith.constant 5.000000e-01 : f32
    %45 = vector.broadcast %cst_17 : f32 to vector<1x16x128xf32>
    %46 = arith.mulf %41, %45 : vector<1x16x128xf32>
    %47 = vector.broadcast %12 : vector<1x16x1xf32> to vector<1x16x128xf32>
    %48 = arith.addf %46, %47 : vector<1x16x128xf32>
    %cst_18 = arith.constant dense<0xFF800000> : vector<1x128xf32>
    %49 = vector.multi_reduction <maximumf>, %48, %cst_18 [1] : vector<1x16x128xf32> to vector<1x128xf32>
    %50 = vector.shape_cast %49 : vector<1x128xf32> to vector<1x1x128xf32>
    %51 = vector.broadcast %50 : vector<1x1x128xf32> to vector<1x16x128xf32>
    %52 = arith.subf %48, %51 : vector<1x16x128xf32>
    %53 = math.exp %52 : vector<1x16x128xf32>
    %cst_19 = arith.constant dense<0.000000e+00> : vector<1x128xf32>
    %54 = vector.multi_reduction <add>, %53, %cst_19 [1] : vector<1x16x128xf32> to vector<1x128xf32>
    %55 = vector.shape_cast %54 : vector<1x128xf32> to vector<1x1x128xf32>
    %56 = tpu.reciprocal %55 {approx = true} : vector<1x1x128xf32> -> vector<1x1x128xf32>
    %57 = vector.broadcast %56 : vector<1x1x128xf32> to vector<1x16x128xf32>
    %58 = arith.mulf %53, %57 : vector<1x16x128xf32>
    %59 = vector.broadcast %44 : vector<1x1x128xf32> to vector<1x16x128xf32>
    %60 = arith.mulf %43, %59 : vector<1x16x128xf32>
    %cst_20 = arith.constant dense<0.000000e+00> : vector<1x16xf32>
    %61 = vector.multi_reduction <add>, %60, %cst_20 [2] : vector<1x16x128xf32> to vector<1x16xf32>
    %62 = vector.shape_cast %61 : vector<1x16xf32> to vector<1x16x1xf32>
    %63 = vector.broadcast %62 : vector<1x16x1xf32> to vector<1x16x128xf32>
    %64 = arith.mulf %63, %58 : vector<1x16x128xf32>
    %cst_21 = arith.constant dense<0.000000e+00> : vector<1x128xf32>
    %65 = vector.multi_reduction <add>, %64, %cst_21 [1] : vector<1x16x128xf32> to vector<1x128xf32>
    %cst_22 = arith.constant 5.000000e-01 : f32
    %66 = vector.broadcast %cst_22 : f32 to vector<1x128xf32>
    %67 = arith.mulf %66, %65 : vector<1x128xf32>
    %cst_23 = arith.constant 0.000000e+00 : f32
    %68 = vector.shape_cast %9 : vector<1x16x1xi1> to vector<1x16x1xi1>
    %69 = vector.broadcast %68 : vector<1x16x1xi1> to vector<1x16x128xi1>
    %70 = vector.broadcast %cst_23 : f32 to vector<1x16x128xf32>
    %71 = arith.select %69, %42, %70 : vector<1x16x128xi1>, vector<1x16x128xf32>
    %cst_24 = arith.constant dense<0.000000e+00> : vector<1x128xf32>
    %72 = vector.multi_reduction <add>, %71, %cst_24 [1] : vector<1x16x128xf32> to vector<1x128xf32>
    %cst_25 = arith.constant 6.250000e-02 : f32
    %73 = vector.broadcast %cst_25 : f32 to vector<1x128xf32>
    %74 = arith.mulf %72, %73 : vector<1x128xf32>
    %cst_26 = arith.constant -1.000000e+30 : f32
    %75 = vector.shape_cast %9 : vector<1x16x1xi1> to vector<1x16x1xi1>
    %76 = vector.broadcast %75 : vector<1x16x1xi1> to vector<1x16x128xi1>
    %77 = vector.broadcast %cst_26 : f32 to vector<1x16x128xf32>
    %78 = arith.select %76, %42, %77 : vector<1x16x128xi1>, vector<1x16x128xf32>
    %cst_27 = arith.constant dense<0xFF800000> : vector<1x128xf32>
    %79 = vector.multi_reduction <maximumf>, %78, %cst_27 [1] : vector<1x16x128xf32> to vector<1x128xf32>
    %80 = arith.addf %74, %79 : vector<1x128xf32>
    %81 = vector.shape_cast %44 : vector<1x1x128xf32> to vector<1x128xf32>
    %cst_28 = arith.constant 1.000000e+00 : f32
    %82 = vector.broadcast %cst_28 : f32 to vector<1x128xf32>
    %83 = arith.mulf %82, %81 : vector<1x128xf32>
    %cst_29 = arith.constant 2.500000e-01 : f32
    %84 = vector.broadcast %cst_29 : f32 to vector<1x128xf32>
    %85 = arith.mulf %84, %80 : vector<1x128xf32>
    %86 = arith.addf %83, %85 : vector<1x128xf32>
    %87 = arith.truncf %86 : vector<1x128xf32> to vector<1x128xbf16>
    %cst_30 = arith.constant dense<0.000000e+00> : vector<1x128xf32>
    %88 = tpu.matmul %87, %0, %cst_30 {dimension_numbers = #tpu.dot_dimension_numbers<[1], [1], [0], [0], [0, 0, 1, 0], [], []>} : vector<1x128xbf16>, vector<128x128xbf16>, vector<1x128xf32> -> vector<1x128xf32>
    %89 = arith.addf %88, %67 : vector<1x128xf32>
    %cst_31 = arith.constant 14.2857141 : f32
    %90 = vector.broadcast %cst_31 : f32 to vector<1x128xf32>
    %91 = arith.mulf %90, %89 : vector<1x128xf32>
    %92 = vector.shape_cast %91 : vector<1x128xf32> to vector<1x1x128xf32>
    %c0_32 = arith.constant 0 : index
    %c0_33 = arith.constant 0 : index
    %c0_34 = arith.constant 0 : index
    %93 = vector.load %arg4[%c0_32, %c0_33, %c0_34] : memref<1x1x128xf32, #tpu.memory_space<vmem>>, vector<1x1x128xf32>
    tpu.vector_store %arg4[%c0_32, %c0_33, %c0_34], %92 {strides = array<i32>} : memref<1x1x128xf32, #tpu.memory_space<vmem>>, vector<1x1x128xf32>,
    return
  }
  func.func @transform_0(%arg0: i32) -> (i32, i32, i32) {
    %c0_i32 = arith.constant 0 : i32
    %c0_i32_0 = arith.constant 0 : i32
    %c0_i32_1 = arith.constant 0 : i32
    return %arg0, %c0_i32, %c0_i32_0 : i32, i32, i32
  }
  func.func @transform_1(%arg0: i32) -> (i32, i32) {
    %c0_i32 = arith.constant 0 : i32
    %c0_i32_0 = arith.constant 0 : i32
    %c0_i32_1 = arith.constant 0 : i32
    return %c0_i32, %c0_i32_0 : i32, i32
  }
  func.func @transform_2(%arg0: i32) -> (i32, i32, i32) {
    %c0_i32 = arith.constant 0 : i32
    %c0_i32_0 = arith.constant 0 : i32
    %c0_i32_1 = arith.constant 0 : i32
    return %arg0, %c0_i32, %c0_i32_0 : i32, i32, i32
  }
  func.func @transform_3(%arg0: i32) -> (i32, i32, i32) {
    %c0_i32 = arith.constant 0 : i32
    %c0_i32_0 = arith.constant 0 : i32
    %c0_i32_1 = arith.constant 0 : i32
    return %arg0, %c0_i32, %c0_i32_0 : i32, i32, i32
  }
}

</mosaic_0001>

<bundles_post_ra>
// kernel: tpu_custom_call.1
= control target key start
LH: loop header
LB: loop body
LE: loop exit
PB: predicated region body
PF: predicated region fallthrough
CT: control target
= control target key end

     0   :  { %8 = vsyncpa [#allocation3], 0  ;;  %s1265_s0 = inlined_call_operand.hbm [shape: f32[2,16,128], index: 0, kind: input, shape index: {}]   ;;  %s1266_s1 = inlined_call_operand.hbm [shape: bf16[128,128], index: 1, kind: input, shape index: {}]   ;;  %s1267_s2 = inlined_call_operand.vmem [shape: f32[2,1,128], index: 2, kind: input, shape index: {}]   ;;  %s1268_s3 = inlined_call_operand.hbm [shape: f32[2,1,128], index: 3, kind: output, shape index: {}]  }
   0x1   :  { %10 = vsyncpa [#allocation3 + $0x1], 0 }
   0x2   :  { %11 = vsyncpa [#allocation6], 0 }
   0x3   :  { %12 = vsyncpa [#allocation4], 0 }
   0x4   :  { %14 = vsyncpa [#allocation4 + $0x1], 0  ;;  %s985_s12 = smov 0   ;;  %s987_s13 = smov 0  }
   0x5   :  { %s989_s14 = smov 0   ;;  %s991_s15 = smov 0  }
   0x6 LB: > { %s1006_s16 = sadd.s32 4294967295, %s954_s15   ;;  %s628_s17 = sadd.s32 4294967294, %s954_s15   ;;  %s954_s15 = sphi %s991_s15, %s1288_s15   ;;  %s950_s14 = sphi %s989_s14, %s1287_s14   ;;  %s946_s13 = sphi %s987_s13, %s1286_s13   ;;  %s942_s12 = sphi %s985_s12, %s1285_s12  }
   0x7   : > { %p40_p0 = scmp.ne.s32.totalorder %s946_s13, %s942_s12  ;;  %p1269_p1 = scmp.eq.s32.totalorder %s1006_s16, 0 }
   0x8   : > { %p117_p3 = scmp.eq.s32.totalorder %s628_s17, 1  ;;  %p629_p5 = scmp.ge.s32.totalorder %s954_s15, 1 }
   0x9   : > { %p1015_p4 = por %p1269_p1, %p40_p0  ;;  %p124_p7 = scmp.lt.s32.totalorder %s954_s15, 3 }
   0xa   : > { %p1020_p6 = por %p117_p3, %p40_p0  ;;  %s956_s21 = smov [#allocation5]  }
   0xb   : > { %s1272_s18 = scalar_select %p1015_p4, 1, 0 }
   0xc   : > { %s1273_s19 = scalar_select %p1020_p6, 1, 0 }
   0xd   : > { %p1025_p8 = pnand %p629_p5, %p124_p7  ;;  %s136_s22 = sshll.u32 %s956_s21, 4  ;;  %s1029_s22 = int_to_ptr.vmem [resolvable:$true] %s136_s22 }
   0xe   : > { %s1041_s24 = sadd.s32 1, %s954_s15   ;;  %s27_s25 = sadd.s32 1, %s950_s14 }
   0xf   : > { %s1274_s20 = scalar_select %p1025_p8, 1, 0 }
  0x10   : > { %p745_p9 = pneg %p1025_p8  ;;  %s24_s26 = ssub.s32 %s954_s15, %s1041_s24 }
  0x11   : > { %s826_s29 = scalar_lea.hbm %s1266_s1, 1024 }
  0x12   : > { %p1036_p11 = pnand %p745_p9, %p1269_p1  ;;  %p827_p12 = scmp.ne.s32.totalorder %s1266_s1, %s826_s29 }
  0x13   : > { %p833_p5 = scmp.lt.u32.totalorder %s826_s29, %s1266_s1 }
  0x14   : > { %p828_p13 = pneg %p1036_p11 }
  0x16   : > { %p829_p0 = pnand %p828_p13, %p827_p12 }
  0x18   : > { %p830_p3 = pneg %p829_p0 }
  0x1a   : > { %p835_p7 = pnand %p833_p5, %p830_p3 }
  0x1c   : > { %838 = shalt.err (!%p835_p7)
}
  0x1d   : > { %s839_s7 = scalar_lea.vmem %s1029_s22, 1024  ;;  %p847_p2 = scmp.lt.s32.totalorder %s1029_s22, %s1029_s22 }
  0x1e   : > { %p840_p9 = scmp.ne.s32.totalorder %s1029_s22, %s839_s7  ;;  %p848_p6 = scmp.lt.s32.totalorder %s839_s7, %s839_s7 }
  0x20   : > { %p842_p10 = pnand %p840_p9, %p828_p13  ;;  %p849_p4 = por %p848_p6, %p847_p2 }
  0x22   : > { %p843_p1 = pneg %p842_p10 }
  0x24   : > { %p850_p8 = pnand %p849_p4, %p843_p1 }
  0x26   : > { %853 = shalt.err (!%p850_p8)
}
  0x27   : > { %s957_s8 = smov 64   ;;  %s958_s9 = smov 4  }
  0x28   : > { %748 = dma.hbm_to_vmem [thread:$0]  (!%p1036_p11), %s1266_s1, 1024, %s1029_s22, [#allocation6], %s957_s8, %s957_s8, %s958_s9  }
  0x29   : > { %p25_p2 = scmp.eq.s32.totalorder %s24_s26, 0  ;;  %p34_p1 = scmp.ne.s32.totalorder %s950_s14, %s946_s13 }
  0x2a   : > { %p35_p4 = scmp.eq.s32.totalorder %s954_s15, 0  ;;  %p758_p6 = scmp.lt.s32.totalorder %s954_s15, 2 }
  0x2b   : > { %s1072_s17 = scalar_select %p25_p2, %s950_s14, %s27_s25  }
  0x2c   : > { %p36_p8 = por %p35_p4, %p34_p1  ;;  %p1276_p10 = scmp.eq.s32.totalorder %s1006_s16, 1 }
  0x2d   : > { %s150_s27 = sand.u32 1, %s950_s14   ;;  %s649_s28 = sshll.u32 %s954_s15, 8 }
  0x2e   : > { %p1076_p12 = por %p1276_p10, %p34_p1  ;;  %s632_s29 = sshll.u32 %s150_s27, 4 }
  0x2f   : > { %s1085_s4 = scalar_lea.hbm %s1265_s0, %s649_s28  ;;  %s154_s22 = scalar_lea.vmem [#allocation2], %s632_s29 }
  0x30   : > { %s161_s25 = sshll.u32 %s154_s22, 4  ;;  %p1087_p11 = pnand %p758_p6, %p36_p8  ;;  %s1091_s25 = int_to_ptr.vmem [resolvable:$true] %s161_s25 }
  0x31   : > { %s1093_s5 = scalar_lea.sflag [#allocation3], %s150_s27  ;;  %s854_s6 = scalar_lea.hbm %s1085_s4, 256 }
  0x32   : > { %p855_p13 = scmp.ne.s32.totalorder %s1085_s4, %s854_s6  ;;  %p856_p0 = pneg %p1087_p11 }
  0x33   : > { %s859_s9 = scalar_lea.hbm %s1265_s0, 512  ;;  %p860_p7 = scmp.lt.u32.totalorder %s1085_s4, %s1265_s0 }
  0x34   : > { %p857_p3 = pnand %p856_p0, %p855_p13  ;;  %p861_p9 = scmp.lt.u32.totalorder %s859_s9, %s854_s6 }
  0x35   : > { %p863_p1 = scmp.lt.u32.totalorder %s854_s6, %s1085_s4 }
  0x36   : > { %p858_p5 = pneg %p857_p3  ;;  %p862_p2 = por %p861_p9, %p860_p7 }
  0x38   : > { %p864_p4 = por %p863_p1, %p862_p2 }
  0x3a   : > { %p865_p6 = pnand %p864_p4, %p858_p5 }
  0x3c   : > { %868 = shalt.err (!%p865_p6)
}
  0x3d   : > { %s869_s27 = scalar_lea.vmem %s1091_s25, 256  ;;  %s959_s28 = smov [#allocation2]  }
  0x3e   : > { %p870_p8 = scmp.ne.s32.totalorder %s1091_s25, %s869_s27  ;;  %s874_s29 = sshll.u32 %s959_s28, 4  ;;  %s875_s29 = int_to_ptr.vmem [resolvable:$false] %s874_s29 }
  0x3f   : > { %s876_s23 = scalar_lea.vmem %s875_s29, 512  ;;  %p877_p3 = scmp.lt.s32.totalorder %s1091_s25, %s875_s29 }
  0x40   : > { %p872_p10 = pnand %p870_p8, %p856_p0  ;;  %p878_p7 = scmp.lt.s32.totalorder %s876_s23, %s869_s27 }
  0x42   : > { %p873_p13 = pneg %p872_p10  ;;  %p879_p9 = por %p878_p7, %p877_p3 }
  0x44   : > { %p880_p2 = pnand %p879_p9, %p873_p13 }
  0x46   : > { %883 = shalt.err (!%p880_p2)
}
  0x47   : > { %s960_s30 = smov 128   ;;  %s961_s22 = smov 8  }
  0x48   : > { %752 = dma.hbm_to_vmem [thread:$0]  (!%p1087_p11), %s1085_s4, 256, %s1091_s25, %s1093_s5, %s960_s30, %s960_s30, %s961_s22  }
  0x49   : > { %p1279_p0 = scmp.ne.s32.totalorder %s1274_s20, 0 }
  0x4a   : > { %s1124_s6 = sand.u32 (!%p1279_p0), 1, %s946_s13   ;;  %p1280_p5 = scmp.ne.s32.totalorder (!%p1279_p0), %s1272_s18, 0 }
  0x4b   : > { %179 = sbr.rel (%p1279_p0) target bundleno = 1252 (0x4e4), region = 32  ;;  %s636_s7 = sshll.u32 (!%p1279_p0), %s1124_s6, 4 }
  0x4c   : > { %s182_s8 = scalar_lea.sflag (!%p1279_p0), [#allocation3], %s1124_s6  ;;  %s185_s9 = scalar_lea.vmem (!%p1279_p0), [#allocation2], %s636_s7 }
  0x52   : > { %929 = dma.done.wait (%p1280_p5), %s182_s8, 256  }
  0x53   : > { %931 = vsyncadd (%p1280_p5), %s182_s8, 4294967040  ;;  %p1281_p1 = scmp.eq.s32.totalorder %s1006_s16, 0 }
  0x55   : > { %933 = dma.done.wait (%p1281_p1), [#allocation6], 1024   ;;  %p1282_p11 = pmov %p1281_p1 }
  0x56   : > { %v962_v0 = vmov 0.0   ;;  %v245_v1 = vld [vmem:[%s185_s9] sm:$0xff]  ;;  %v246_v2 = vld [vmem:[%s185_s9 + $0x8] sm:$0xff]  ;;  %vm963_vm0 = vmmov 0   ;;  %v234_v22 = vlaneseq  ;;  %p214_p4 = scmp.lt.s32.totalorder %s1006_s16, 1  ;;  %s646_s26 = sshll.u32 %s1006_s16, 4 }
  0x57   : > { %935 = vsyncadd (%p1282_p11), [#allocation6], 4294966272  ;;  %677 = vmatprep.subr.bf16.mxu0 %v962_v0  ;;  %697 = vmatprep.subr.bf16.mxu1 %v962_v0  ;;  %v247_v3 = vmul.f32 %v245_v1, %v245_v1  ;;  %v1138_v4 = vld [vmem:[#allocation5] sm:$0xff]   ;;  %v248_v5 = vmul.f32 %v246_v2, %v246_v2  ;;  %v1144_v6 = vld [vmem:[#allocation5 + $0x8] sm:$0xff]   ;;  %s213_s5 = scalar_lea.vmem [#allocation7], %s1124_s6  ;;  %s1221_s28 = scalar_lea.hbm %s1268_s3, %s646_s26 }
  0x58   : > { %678 = vmatpush3.bf16.xpose.msra.mxu0 %v1138_v4  ;;  %698 = vmatpush3.bf16.msra.mxu1 %v1138_v4  ;;  %v1148_v7 = vld [vmem:[#allocation5 + $0x10] sm:$0xff]   ;;  %v1154_v8 = vld [vmem:[#allocation5 + $0x18] sm:$0xff]   ;;  %v1158_v9 = vld [vmem:[#allocation5 + $0x20] sm:$0xff]   ;;  %v235_v23 = vand.u32 127, %v234_v22  ;;  %s215_s18 = scalar_select %p214_p4, %s1006_s16, 1  ;;  %v441_v61 = vshrl.u32 %v234_v22, 7 }
  0x59   : > { %249 = vadd.xlane.f32.xlu0 %v247_v3  ;;  %679 = vmatprep.subr.bf16.mxu0 %v962_v0  ;;  %v1164_v10 = vld [vmem:[#allocation5 + $0x28] sm:$0xff]   ;;  %v1172_v11 = vld [vmem:[#allocation5 + $0x30] sm:$0xff]   ;;  %v1178_v12 = vld [vmem:[#allocation5 + $0x38] sm:$0xff]   ;;  %s543_s10 = sshll.u32 %s213_s5, 4  ;;  %s531_s29 = scalar_lea.sflag [#allocation4], %s1124_s6  ;;  %s1223_s10 = int_to_ptr.vmem [resolvable:$true] %s543_s10 }
  0x5a   : > { %699 = vmatprep.subr.bf16.mxu1 %v962_v0  ;;  %693 = vmatprep.mubr.msk.bf16.mxu0 %vm963_vm0, %v962_v0  ;;  %vm236_vm1 = vcmp.ge.s32.totalorder %v235_v23, 8  ;;  %s216_s25 = scalar_lea.vmem %s1267_s2, %s215_s18  ;;  %v442_v63 = vsub.s32 0, %v441_v61  ;;  %s884_s16 = scalar_lea.vmem %s1223_s10, 16 }
  0x5b   : > { %713 = vmatprep.mubr.msk.bf16.mxu1 %vm963_vm0, %v962_v0  ;;  %v237_v24 = vsel %vm236_vm1, -1e+30, %v962_v0  ;;  %p885_p6 = scmp.ne.s32.totalorder %s1223_s10, %s884_s16  ;;  %s964_s23 = smov [#allocation7]  }
  0x5c   : > { %700 = vmatpush3.bf16.msra.mxu1 %v1144_v6  ;;  %s888_s30 = sshll.u32 %s964_s23, 4  ;;  %s889_s30 = int_to_ptr.vmem [resolvable:$false] %s888_s30 }
  0x5d   : > { %251 = vadd.xlane.f32.xlu0 %v248_v5  ;;  %701 = vmatprep.subr.bf16.mxu1 %v962_v0  ;;  %p886_p8 = pnand %p885_p6, %p1076_p12  ;;  %s890_s22 = scalar_lea.vmem %s889_s30, 32 }
  0x5e   : > { %p891_p13 = scmp.lt.s32.totalorder %s1223_s10, %s889_s30  ;;  %p892_p3 = scmp.lt.s32.totalorder %s890_s22, %s884_s16 }
  0x5f   : > { %p887_p10 = pneg %p886_p8 }
  0x60   : > { %680 = vmatpush3.bf16.xpose.msra.mxu0 %v1144_v6  ;;  %702 = vmatpush3.bf16.msra.mxu1 %v1148_v7  ;;  %p893_p7 = por %p892_p3, %p891_p13 }
  0x61   : > { %681 = vmatprep.subr.bf16.mxu0 %v962_v0  ;;  %703 = vmatprep.subr.bf16.mxu1 %v962_v0 }
  0x62   : > { %p894_p9 = pnand %p893_p7, %p887_p10 }
  0x64   : > { %704 = vmatpush3.bf16.msra.mxu1 %v1154_v8 }
  0x65   : > { %705 = vmatprep.subr.bf16.mxu1 %v962_v0 }
  0x68   : > { %682 = vmatpush3.bf16.xpose.msra.mxu0 %v1148_v7  ;;  %706 = vmatpush3.bf16.msra.mxu1 %v1158_v9 }
  0x69   : > { %683 = vmatprep.subr.bf16.mxu0 %v962_v0  ;;  %707 = vmatprep.subr.bf16.mxu1 %v962_v0 }
  0x6c   : > { %708 = vmatpush3.bf16.msra.mxu1 %v1164_v10 }
  0x6d   : > { %709 = vmatprep.subr.bf16.mxu1 %v962_v0 }
  0x70   : > { %684 = vmatpush3.bf16.xpose.msra.mxu0 %v1154_v8  ;;  %710 = vmatpush3.bf16.msra.mxu1 %v1172_v11 }
  0x71   : > { %685 = vmatprep.subr.bf16.mxu0 %v962_v0  ;;  %711 = vmatprep.subr.bf16.mxu1 %v962_v0 }
  0x74   : > { %712 = vmatpush3.bf16.msra.mxu1 %v1178_v12 }
  0x75   : > { %717 = vmatprep.subr.bf16.mxu1 %v962_v0 }
  0x78   : > { %686 = vmatpush3.bf16.xpose.msra.mxu0 %v1158_v9 }
  0x79   : > { %687 = vmatprep.subr.bf16.mxu0 %v962_v0 }
  0x80   : > { %688 = vmatpush3.bf16.xpose.msra.mxu0 %v1164_v10 }
  0x81   : > { %689 = vmatprep.subr.bf16.mxu0 %v962_v0 }
  0x88   : > { %690 = vmatpush3.bf16.xpose.msra.mxu0 %v1172_v11 }
  0x89   : > { %691 = vmatprep.subr.bf16.mxu0 %v962_v0 }
  0x90   : > { %692 = vmatpush3.bf16.xpose.msra.mxu0 %v1178_v12 }
  0xe6   : > { %v250_v13 = vpop.xlane.xlu0 %249 }
  0xe7   : > { %v253_v14 = vadd.f32 1e-30, %v250_v13 }
  0xe9   : > { %808 = vrsqrt.f32 %v253_v14 }
  0xea   : > { %v252_v15 = vpop.xlane.xlu0 %251 }
  0xeb   : > { %v254_v16 = vadd.f32 1e-30, %v252_v15 }
  0xed   : > { %810 = vrsqrt.f32 %v254_v16 }
  0xf3   : > { %v809_v17 = vpop.eup %808 }
  0xf4   : > { %v257_v19 = vmul.f32 %v809_v17, %v245_v1  ;;  %v411_v1 = vld [vmem:[%s216_s25] sm:$0x1] }
  0xf7   : > { %v811_v18 = vpop.eup %810 }
  0xf8   : > { %v1189_v20 = vmul.f32 %v811_v18, %v246_v2  ;;  %v443_v2 = vrot.slane %v411_v1, %v442_v63 }
  0xfa   : > { %v259_v21 = vpack.c.bf16 %v1189_v20, %v257_v19  ;;  %v445_v5 = vmul.f32 %v443_v2, %v257_v19  ;;  %v446_v14 = vmul.f32 %v443_v2, %v1189_v20 }
  0xfc   : > { %694 = vmatmul.mubr.bf16.vlgmr.msra.gmra.mrb[0].mxu0 %v259_v21 }
 0x1cf   : > { %v342_v25 = vpop.f32.mrb[0].mxu0 }
 0x1d0   : > { %v695_v26 = vpop.f32.mrb[1].mxu0  ;;  %v349_v27 = vadd.f32 %v342_v25, %v237_v24  ;;  %v412_v29 = vmul.f32 0.5, %v342_v25 }
 0x1d1   : > { %v345_v28 = vpop.f32.mrb[2].mxu0 }
 0x1d2   : > { %v413_v30 = vmul.f32 0.5, %v345_v28  ;;  %351 = vmax.xlane.f32.xlu1 %v349_v27  ;;  %v696_v31 = vpop.f32.mrb[3].mxu0  ;;  %v350_v33 = vadd.f32 %v345_v28, %v237_v24 }
 0x1d4   : > { %v416_v32 = vmax.f32 %v412_v29, %v413_v30 }
 0x1d6   : > { %v417_v34 = vrot.slane %v416_v32, 4  ;;  %353 = vmax.xlane.f32.xlu1 %v350_v33 }
 0x1d8   : > { %v418_v35 = vmax.f32 %v416_v32, %v417_v34 }
 0x1da   : > { %v419_v36 = vrot.slane %v418_v35, 2 }
 0x1dc   : > { %v420_v37 = vmax.f32 %v418_v35, %v419_v36 }
 0x1de   : > { %v421_v38 = vrot.slane %v420_v37, 1 }
 0x1e0   : > { %v422_v39 = vmax.f32 %v420_v37, %v421_v38 }
 0x1e2   : > { %v423_v40 = vsub.f32 %v412_v29, %v422_v39  ;;  %v424_v41 = vsub.f32 %v413_v30, %v422_v39 }
 0x1e4   : > { %v425_v42 = vmul.f32 1.442695, %v423_v40  ;;  %v427_v43 = vmul.f32 1.442695, %v424_v41 }
 0x1e6   : > { %812 = vpow2.f32 %v425_v42 }
 0x1e7   : > { %814 = vpow2.f32 %v427_v43 }
 0x1f0   : > { %v813_v44 = vpop.eup %812 }
 0x1f1   : > { %v815_v45 = vpop.eup %814 }
 0x1f2   : > { %v429_v46 = vadd.f32 %v815_v45, %v813_v44 }
 0x1f4   : > { %v430_v47 = vrot.slane %v429_v46, 4 }
 0x1f6   : > { %v431_v48 = vadd.f32 %v430_v47, %v429_v46 }
 0x1f8   : > { %v432_v49 = vrot.slane %v431_v48, 2 }
 0x1fa   : > { %v433_v50 = vadd.f32 %v432_v49, %v431_v48 }
 0x1fc   : > { %v434_v51 = vrot.slane %v433_v50, 1 }
 0x1fe   : > { %v435_v52 = vadd.f32 %v434_v51, %v433_v50 }
 0x200   : > { %816 = vrcp.f32 %v435_v52 }
 0x20a   : > { %v817_v53 = vpop.eup %816 }
 0x20b   : > { %v437_v54 = vmul.f32 %v817_v53, %v813_v44  ;;  %v438_v55 = vmul.f32 %v817_v53, %v815_v45 }
 0x25f   : > { %v352_v56 = vpop.xlane.xlu1 %351 }
 0x260   : > { %v355_v57 = vsub.f32 %v349_v27, %v352_v56 }
 0x262   : > { %v357_v58 = vmul.f32 1.442695, %v355_v57 }
 0x263   : > { %v354_v59 = vpop.xlane.xlu1 %353 }
 0x264   : > { %818 = vpow2.f32 %v357_v58  ;;  %v356_v60 = vsub.f32 %v350_v33, %v354_v59 }
 0x266   : > { %v359_v62 = vmul.f32 1.442695, %v356_v60 }
 0x268   : > { %820 = vpow2.f32 %v359_v62 }
 0x26e   : > { %v819_v3 = vpop.eup %818 }
 0x26f   : > { %361 = vadd.xlane.f32.xlu0 %v819_v3 }
 0x272   : > { %v821_v13 = vpop.eup %820 }
 0x273   : > { %447 = vadd.xlane.f32.xlu0 %v445_v5  ;;  %363 = vadd.xlane.f32.xlu1 %v821_v13 }
 0x277   : > { %449 = vadd.xlane.f32.xlu1 %v446_v14 }
 0x2fc   : > { %v362_v15 = vpop.xlane.xlu0 %361 }
 0x2fd   : > { %822 = vrcp.f32 %v362_v15 }
 0x300   : > { %v364_v16 = vpop.xlane.xlu1 %363  ;;  %v448_v17 = vpop.xlane.xlu0 %447 }
 0x301   : > { %824 = vrcp.f32 %v364_v16  ;;  %v451_v21 = vmul.f32 %v448_v17, %v437_v54 }
 0x304   : > { %v450_v18 = vpop.xlane.xlu1 %449 }
 0x305   : > { %v452_v22 = vmul.f32 %v450_v18, %v438_v55 }
 0x307   : > { %v453_v23 = vadd.f32 %v452_v22, %v451_v21  ;;  %v823_v24 = vpop.eup %822 }
 0x308   : > { %v367_v26 = vmul.f32 %v823_v24, %v819_v3 }
 0x309   : > { %v454_v41 = vrot.slane %v453_v23, 4 }
 0x30b   : > { %v825_v25 = vpop.eup %824  ;;  %v455_v42 = vadd.f32 %v454_v41, %v453_v23 }
 0x30c   : > { %v368_v27 = vmul.f32 %v825_v25, %v821_v13 }
 0x30d   : > { %v456_v43 = vrot.slane %v455_v42, 2 }
 0x30e   : > { %v369_v19 = vpack.c.bf16 %v368_v27, %v367_v26 }
 0x30f   : > { %v457_v44 = vadd.f32 %v456_v43, %v455_v42 }
 0x310   : > { %714 = vmatmul.mubr.bf16.vlgmr.msra.gmra.mrb[0].mxu1 %v369_v19 }
 0x311   : > { %718 = vmatpush3.bf16.xpose.msra.mxu1 %v1138_v4  ;;  %733 = vmatprep.mubr.msk.bf16.mxu1 %vm963_vm0, %v962_v0  ;;  %v458_v45 = vrot.slane %v457_v44, 1 }
 0x312   : > { %719 = vmatprep.subr.bf16.mxu1 %v962_v0 }
 0x313   : > { %v459_v46 = vadd.f32 %v458_v45, %v457_v44 }
 0x315   : > { %v460_v47 = vmul.f32 0.5, %v459_v46 }
 0x319   : > { %720 = vmatpush3.bf16.xpose.msra.mxu1 %v1144_v6 }
 0x31a   : > { %721 = vmatprep.subr.bf16.mxu1 %v962_v0 }
 0x321   : > { %722 = vmatpush3.bf16.xpose.msra.mxu1 %v1148_v7 }
 0x322   : > { %723 = vmatprep.subr.bf16.mxu1 %v962_v0 }
 0x329   : > { %724 = vmatpush3.bf16.xpose.msra.mxu1 %v1154_v8 }
 0x32a   : > { %725 = vmatprep.subr.bf16.mxu1 %v962_v0 }
 0x331   : > { %726 = vmatpush3.bf16.xpose.msra.mxu1 %v1158_v9 }
 0x332   : > { %727 = vmatprep.subr.bf16.mxu1 %v962_v0 }
 0x339   : > { %728 = vmatpush3.bf16.xpose.msra.mxu1 %v1164_v10 }
 0x33a   : > { %729 = vmatprep.subr.bf16.mxu1 %v962_v0 }
 0x341   : > { %730 = vmatpush3.bf16.xpose.msra.mxu1 %v1172_v11 }
 0x342   : > { %731 = vmatprep.subr.bf16.mxu1 %v962_v0 }
 0x349   : > { %732 = vmatpush3.bf16.xpose.msra.mxu1 %v1178_v12 }
 0x3e3   : > { %v404_v4 = vpop.f32.mrb[0].mxu1 }
 0x3e4   : > { %v715_v6 = vpop.f32.mrb[1].mxu1 }
 0x3e5   : > { %v407_v7 = vpop.f32.mrb[2].mxu1 }
 0x3e6   : > { %v467_v8 = vadd.f32 %v407_v7, %v404_v4  ;;  %v477_v20 = vmax.f32 %v404_v4, %v407_v7  ;;  %v716_v28 = vpop.f32.mrb[3].mxu1 }
 0x3e8   : > { %v468_v29 = vrot.slane %v467_v8, 4  ;;  %v478_v9 = vrot.slane %v477_v20, 4 }
 0x3ea   : > { %v469_v30 = vadd.f32 %v468_v29, %v467_v8  ;;  %v479_v31 = vmax.f32 %v477_v20, %v478_v9 }
 0x3ec   : > { %v470_v32 = vrot.slane %v469_v30, 2  ;;  %v480_v10 = vrot.slane %v479_v31, 2 }
 0x3ee   : > { %v471_v33 = vadd.f32 %v470_v32, %v469_v30  ;;  %v481_v34 = vmax.f32 %v479_v31, %v480_v10 }
 0x3f0   : > { %v472_v35 = vrot.slane %v471_v33, 1  ;;  %v482_v11 = vrot.slane %v481_v34, 1 }
 0x3f2   : > { %v473_v36 = vadd.f32 %v472_v35, %v471_v33  ;;  %v483_v12 = vmax.f32 %v481_v34, %v482_v11 }
 0x3f4   : > { %v474_v0 = vmul.f32 0.0625, %v473_v36 }
 0x3f6   : > { %v484_v37 = vadd.f32 %v483_v12, %v474_v0 }
 0x3f8   : > { %v485_v38 = vmul.f32 0.25, %v484_v37 }
 0x3fa   : > { %v486_v39 = vadd.f32 %v485_v38, %v411_v1 }
 0x3fc   : > { %v487_v40 = vpack.c.bf16 %v486_v39, %v486_v39 }
 0x3fe   : > { %734 = vmatmul.mubr.bf16.vlgmr.msra.gmra.mrb[4].mxu1 %v487_v40 }
 0x4d1   : > { %v522_v48 = vpop.f32.mrb[4].mxu1 }
 0x4d2   : > { %v523_v49 = vadd.f32 %v522_v48, %v460_v47  ;;  %v735_v50 = vpop.f32.mrb[5].mxu1 }
 0x4d3   : > { %v525_v51 = vpop.f32.mrb[6].mxu1 }
 0x4d4   : > { %v528_v52 = vmul.f32 14.285714, %v523_v49  ;;  %v736_v53 = vpop.f32.mrb[7].mxu1 }
 0x4d6   : > { %529 = vst [vmem:[%s213_s5] sm:$0x1] %v528_v52 }
 0x4d7   : > { %897 = shalt.err (!%p894_p9)
}
 0x4d8   : > { %s898_s6 = scalar_lea.hbm %s1221_s28, 16  ;;  %s902_s9 = scalar_lea.hbm %s1268_s3, 32 }
 0x4d9   : > { %p899_p2 = scmp.ne.s32.totalorder %s1221_s28, %s898_s6  ;;  %p903_p1 = scmp.lt.u32.totalorder %s1221_s28, %s1268_s3 }
 0x4da   : > { %p904_p11 = scmp.lt.u32.totalorder %s902_s9, %s898_s6  ;;  %p906_p6 = scmp.lt.u32.totalorder %s898_s6, %s1221_s28 }
 0x4db   : > { %p900_p0 = pnand %p899_p2, %p1076_p12 }
 0x4dc   : > { %p905_p4 = por %p904_p11, %p903_p1 }
 0x4dd   : > { %p901_p5 = pneg %p900_p0 }
 0x4de   : > { %p907_p8 = por %p906_p6, %p905_p4 }
 0x4e0   : > { %p908_p10 = pnand %p907_p8, %p901_p5 }
 0x4e2   : > { %911 = shalt.err (!%p908_p10)
}
 0x4e3   : > { %743 = dma.vmem_to_hbm [thread:$0]  (%p1076_p12), %s1223_s10, 16, %s1221_s28, %s531_s29  }
 0x4e4 PF: > { %s555_s4 = sand.u32 1, %s942_s12   ;;  %p1283_p13 = scmp.ne.s32.totalorder %s1273_s19, 0 }
 0x4e5   : > { %p1284_p3 = scmp.ge.s32.totalorder %s954_s15, 2  ;;  %s556_s25 = scalar_lea.sflag [#allocation4], %s555_s4 }
 0x4e7   : > { %p754_p7 = pnand %p1284_p3, %p1283_p13 }
 0x4e9   : > { %937 = dma.done.wait (!%p754_p7), %s556_s25, 16  }
 0x4ea   : > { %939 = vsyncadd (!%p754_p7), %s556_s25, 4294967280  ;;  %p17_p9 = scmp.ge.s32.totalorder %s1041_s24, 4   ;;  %s1285_s12 = smov %s946_s13 }
 0x4eb   : > { %s1286_s13 = smov %s950_s14  ;;  %s1287_s14 = smov %s1072_s17 }
 0x4ec   : > { %s1288_s15 = smov %s1041_s24  ;;  %19 = sbr.rel (!%p17_p9) target bundleno = 6 (0x6), region = 84 }
 0x4f3   :  { %560 = vsyncpa [#allocation3], 1 }
 0x4f4   :  { %562 = vsyncpa [#allocation3 + $0x1], 1 }
 0x4f5   :  { %563 = vsyncpa [#allocation6], 1 }
 0x4f6   :  { %564 = vsyncpa [#allocation4], 1 }
 0x4f7   :  { %566 = vsyncpa [#allocation4 + $0x1], 1 }

</bundles_post_ra>
